<compile_context>
chip_gen: v6e
topology: v6e:2x2x1
jax: 0.10.0
libtpu: 0.0.40
codegen_flags: <defaults>
</compile_context>

<pallas_src>
import functools

import jax
import jax.numpy as jnp
from jax import lax
from jax.experimental import pallas as pl
from jax.experimental.pallas import tpu as pltpu


def _round_up(n: int, m: int) -> int:
    return (n + m - 1) // m * m


def _pick_lane_tile(dpad: int, max_td: int) -> int:
    """Largest multiple of 128 that divides dpad and is <= max_td."""
    max_td = max(128, (max_td // 128) * 128)
    if dpad <= max_td:
        return dpad
    for cand in range(max_td, 127, -128):
        if dpad % cand == 0:
            return cand
    return 128  # unreachable: dpad is a multiple of 128


def _reverse_sublanes(a, tb: int):
    """Reverse the rows (sublane axis) of a (tb, n) block; tb is static."""
    if tb == 1:
        return a
    if tb <= 4:
        # Tiny batch blocks: mask-and-select reverse (pure VPU, always lowers).
        row = lax.broadcasted_iota(jnp.int32, a.shape, 0)
        out = a
        for k in range(tb):
            out = jnp.where(row == (tb - 1 - k), a[k:k + 1, :], out)
        return out
    # Sublane-full blocks: antidiagonal permutation matmul on the idle MXU.
    r = lax.broadcasted_iota(jnp.int32, (tb, tb), 0)
    c = lax.broadcasted_iota(jnp.int32, (tb, tb), 1)
    perm = (r + c == tb - 1).astype(a.dtype)
    return jnp.dot(perm, a, preferred_element_type=jnp.float32).astype(a.dtype)


def _mix_rows_kernel(lam_ref, xi_ref, xj_ref, o_ref, *, tb: int):
    # lam_ref: (tb, 1)  per-row mixup coefficients lambda_r
    # xi_ref : (tb, TD) rows r = i*tb + k
    # xj_ref : (tb, TD) partner block nb-1-i; reversed rows give x[B-1-r]
    lam = lam_ref[...]
    xi = xi_ref[...]
    xjr = _reverse_sublanes(xj_ref[...], tb)
    o_ref[...] = (lam * xi + (1.0 - lam) * xjr).astype(o_ref.dtype)


def _mix_rows(arr, lam_col, *, max_lane_tile: int = 4096):
    """out[r] = lam[r] * arr[r] + (1 - lam[r]) * arr[B-1-r] for a (B, D) array."""
    B, D = arr.shape
    TB = 8 if B % 8 == 0 else B          # sublane-full blocks when possible
    nb = B // TB
    Dpad = _round_up(D, 128)             # lane-dense, unmasked stores
    if Dpad != D:
        arr = jnp.pad(arr, ((0, 0), (0, Dpad - D)))
    TD = _pick_lane_tile(Dpad, max_lane_tile)
    nl = Dpad // TD

    out = pl.pallas_call(
        functools.partial(_mix_rows_kernel, tb=TB),
        out_shape=jax.ShapeDtypeStruct((B, Dpad), arr.dtype),
        grid_spec=pltpu.PrefetchScalarGridSpec(
            num_scalar_prefetch=0,
            grid=(nb, nl),
            in_specs=[
                pl.BlockSpec((TB, 1), lambda i, l: (i, 0)),            # lambda
                pl.BlockSpec((TB, TD), lambda i, l: (i, l)),           # block i
                pl.BlockSpec((TB, TD), lambda i, l: (nb - 1 - i, l)),  # partner
            ],
            out_specs=pl.BlockSpec((TB, TD), lambda i, l: (i, l)),
        ),
        compiler_params=pltpu.CompilerParams(
            dimension_semantics=("parallel", "parallel"),
        ),
    )(lam_col, arr, arr)

    if Dpad != D:
        out = out[:, :D]
    return out


@jax.jit
def _swmixup_apply(x, y, lam):
    B = x.shape[0]
    lam_col = lam.reshape(B, 1).astype(jnp.float32)
    xf = x if jnp.issubdtype(x.dtype, jnp.floating) else x.astype(jnp.float32)
    yf = y if jnp.issubdtype(y.dtype, jnp.floating) else y.astype(jnp.float32)
    out_x = _mix_rows(xf.reshape(B, -1), lam_col).reshape(xf.shape)
    out_y = _mix_rows(yf, lam_col)
    return out_x, out_y


class SWMixUpPallas:
    """JAX/Pallas port of SWMixUp."""

    def __init__(self, mixup_alpha: float):
        self.mixup_alpha = mixup_alpha

    def __call__(self, batch, key):
        x = batch["image"]          # (B, C, H, W)
        y = batch["tags"]           # (B, T)
        B = x.shape[0]
        # Beta(alpha, alpha) sample per batch element (glue, plain JAX).
        lam = jax.random.beta(
            key, self.mixup_alpha, self.mixup_alpha, shape=(B,)
        ).astype(jnp.float32)
        out_x, out_y = _swmixup_apply(x, y, lam)
        return dict(batch) | {"image": out_x, "tags": out_y}


if __name__ == "__main__":
    key = jax.random.PRNGKey(0)
    k1, k2, k3, k4, k5, k6 = jax.random.split(key, 6)

    def reference(image, tags, lam):
        xl = lam.reshape(-1, 1, 1, 1)
        yl = lam.reshape(-1, 1)
        ref_x = image * xl + image[::-1] * (1.0 - xl)
        ref_y = tags * yl + tags[::-1] * (1.0 - yl)
        return ref_x, ref_y

    module = SWMixUpPallas(mixup_alpha=0.4)

    # Case 1: tiny batch (B=2), full-row lane block.
    B, C, H, W, T = 2, 4, 16, 16, 128
    image = jax.random.normal(k1, (B, C, H, W), dtype=jnp.float32)
    tags = jax.random.uniform(k2, (B, T), dtype=jnp.float32)
    out = module({"image": image, "tags": tags}, k3)
    jax.block_until_ready(out["image"])
    jax.block_until_ready(out["tags"])
    lam = jax.random.beta(k3, 0.4, 0.4, shape=(B,)).astype(jnp.float32)
    ref_x, ref_y = reference(image, tags, lam)
    assert jnp.allclose(out["image"], ref_x, atol=1e-6)
    assert jnp.allclose(out["tags"], ref_y, atol=1e-6)

    # Case 2: 8-row sublane-full blocks, lane-tiled image, padded tag width.
    B, C, H, W, T = 16, 3, 48, 48, 100
    image = jax.random.normal(k4, (B, C, H, W), dtype=jnp.float32)
    tags = jax.random.uniform(k5, (B, T), dtype=jnp.float32)
    out = module({"image": image, "tags": tags}, k6)
    jax.block_until_ready(out["image"])
    jax.block_until_ready(out["tags"])
    lam = jax.random.beta(k6, 0.4, 0.4, shape=(B,)).astype(jnp.float32)
    ref_x, ref_y = reference(image, tags, lam)
    assert jnp.allclose(out["image"], ref_x, atol=1e-6)
    assert jnp.allclose(out["tags"], ref_y, atol=1e-6)

    print("KERNEL_OK")
</pallas_src>

<mosaic_0001>
module attributes {stable_mosaic.version = 11 : i64} {
  func.func @_mix_rows_kernel(%arg0: i32, %arg1: i32, %arg2: memref<2x1xf32, #tpu.memory_space<vmem>>, %arg3: memref<2x1024xf32, #tpu.memory_space<vmem>>, %arg4: memref<2x1024xf32, #tpu.memory_space<vmem>>, %arg5: memref<2x1024xf32, #tpu.memory_space<vmem>>) attributes {dimension_semantics = [#tpu.dimension_semantics<parallel>, #tpu.dimension_semantics<parallel>], iteration_bounds = array<i64: 1, 1>, scalar_prefetch = 0 : i64, scratch_operands = 0 : i64, tpu.core_type = #tpu.core_type<tc>, window_params = [{transform_indices = @transform_0, window_bounds = array<i64: 2, 1>}, {transform_indices = @transform_1, window_bounds = array<i64: 2, 1024>}, {transform_indices = @transform_2, window_bounds = array<i64: 2, 1024>}, {transform_indices = @transform_3, window_bounds = array<i64: 2, 1024>}]} {
    %c0 = arith.constant 0 : index
    %c0_0 = arith.constant 0 : index
    %0 = vector.load %arg2[%c0, %c0_0] : memref<2x1xf32, #tpu.memory_space<vmem>>, vector<2x1xf32>
    %c0_1 = arith.constant 0 : index
    %c0_2 = arith.constant 0 : index
    %1 = vector.load %arg3[%c0_1, %c0_2] : memref<2x1024xf32, #tpu.memory_space<vmem>>, vector<2x1024xf32>
    %c0_3 = arith.constant 0 : index
    %c0_4 = arith.constant 0 : index
    %2 = vector.load %arg4[%c0_3, %c0_4] : memref<2x1024xf32, #tpu.memory_space<vmem>>, vector<2x1024xf32>
    %3 = tpu.iota {dimensions = array<i32: 0>} : vector<2x1024xi32>
    %c1_i32 = arith.constant 1 : i32
    %4 = vector.broadcast %c1_i32 : i32 to vector<2x1024xi32>
    %5 = arith.cmpi eq, %3, %4 : vector<2x1024xi32>
    %6 = vector.extract_strided_slice %2 {offsets = [0, 0], sizes = [1, 1024], strides = [1, 1]} : vector<2x1024xf32> to vector<1x1024xf32>
    %7 = vector.shape_cast %6 : vector<1x1024xf32> to vector<1x1024xf32>
    %8 = vector.broadcast %7 : vector<1x1024xf32> to vector<2x1024xf32>
    %9 = arith.select %5, %8, %2 : vector<2x1024xi1>, vector<2x1024xf32>
    %c0_i32 = arith.constant 0 : i32
    %10 = vector.broadcast %c0_i32 : i32 to vector<2x1024xi32>
    %11 = arith.cmpi eq, %3, %10 : vector<2x1024xi32>
    %12 = vector.extract_strided_slice %2 {offsets = [1, 0], sizes = [1, 1024], strides = [1, 1]} : vector<2x1024xf32> to vector<1x1024xf32>
    %13 = vector.shape_cast %12 : vector<1x1024xf32> to vector<1x1024xf32>
    %14 = vector.broadcast %13 : vector<1x1024xf32> to vector<2x1024xf32>
    %15 = arith.select %11, %14, %9 : vector<2x1024xi1>, vector<2x1024xf32>
    %16 = vector.broadcast %0 : vector<2x1xf32> to vector<2x1024xf32>
    %17 = arith.mulf %16, %1 : vector<2x1024xf32>
    %cst = arith.constant 1.000000e+00 : f32
    %18 = vector.broadcast %cst : f32 to vector<2x1xf32>
    %19 = arith.subf %18, %0 : vector<2x1xf32>
    %20 = vector.broadcast %19 : vector<2x1xf32> to vector<2x1024xf32>
    %21 = arith.mulf %20, %15 : vector<2x1024xf32>
    %22 = arith.addf %17, %21 : vector<2x1024xf32>
    %c0_5 = arith.constant 0 : index
    %c0_6 = arith.constant 0 : index
    %23 = vector.load %arg5[%c0_5, %c0_6] : memref<2x1024xf32, #tpu.memory_space<vmem>>, vector<2x1024xf32>
    tpu.vector_store %arg5[%c0_5, %c0_6], %22 {strides = array<i32>} : memref<2x1024xf32, #tpu.memory_space<vmem>>, vector<2x1024xf32>,
    return
  }
  func.func @transform_0(%arg0: i32, %arg1: i32) -> (i32, i32) {
    %c0_i32 = arith.constant 0 : i32
    %c0_i32_0 = arith.constant 0 : i32
    return %arg0, %c0_i32 : i32, i32
  }
  func.func @transform_1(%arg0: i32, %arg1: i32) -> (i32, i32) {
    %c0_i32 = arith.constant 0 : i32
    return %arg0, %arg1 : i32, i32
  }
  func.func @transform_2(%arg0: i32, %arg1: i32) -> (i32, i32) {
    %c0_i32 = arith.constant 0 : i32
    %0 = arith.subi %c0_i32, %arg0 : i32
    %c0_i32_0 = arith.constant 0 : i32
    return %0, %arg1 : i32, i32
  }
  func.func @transform_3(%arg0: i32, %arg1: i32) -> (i32, i32) {
    %c0_i32 = arith.constant 0 : i32
    return %arg0, %arg1 : i32, i32
  }
}

module attributes {stable_mosaic.version = 11 : i64} {
  func.func @_mix_rows_kernel(%arg0: i32, %arg1: i32, %arg2: memref<2x1xf32, #tpu.memory_space<vmem>>, %arg3: memref<2x128xf32, #tpu.memory_space<vmem>>, %arg4: memref<2x128xf32, #tpu.memory_space<vmem>>, %arg5: memref<2x128xf32, #tpu.memory_space<vmem>>) attributes {dimension_semantics = [#tpu.dimension_semantics<parallel>, #tpu.dimension_semantics<parallel>], iteration_bounds = array<i64: 1, 1>, scalar_prefetch = 0 : i64, scratch_operands = 0 : i64, tpu.core_type = #tpu.core_type<tc>, window_params = [{transform_indices = @transform_0, window_bounds = array<i64: 2, 1>}, {transform_indices = @transform_1, window_bounds = array<i64: 2, 128>}, {transform_indices = @transform_2, window_bounds = array<i64: 2, 128>}, {transform_indices = @transform_3, window_bounds = array<i64: 2, 128>}]} {
    %c0 = arith.constant 0 : index
    %c0_0 = arith.constant 0 : index
    %0 = vector.load %arg2[%c0, %c0_0] : memref<2x1xf32, #tpu.memory_space<vmem>>, vector<2x1xf32>
    %c0_1 = arith.constant 0 : index
    %c0_2 = arith.constant 0 : index
    %1 = vector.load %arg3[%c0_1, %c0_2] : memref<2x128xf32, #tpu.memory_space<vmem>>, vector<2x128xf32>
    %c0_3 = arith.constant 0 : index
    %c0_4 = arith.constant 0 : index
    %2 = vector.load %arg4[%c0_3, %c0_4] : memref<2x128xf32, #tpu.memory_space<vmem>>, vector<2x128xf32>
    %3 = tpu.iota {dimensions = array<i32: 0>} : vector<2x128xi32>
    %c1_i32 = arith.constant 1 : i32
    %4 = vector.broadcast %c1_i32 : i32 to vector<2x128xi32>
    %5 = arith.cmpi eq, %3, %4 : vector<2x128xi32>
    %6 = vector.extract_strided_slice %2 {offsets = [0, 0], sizes = [1, 128], strides = [1, 1]} : vector<2x128xf32> to vector<1x128xf32>
    %7 = vector.shape_cast %6 : vector<1x128xf32> to vector<1x128xf32>
    %8 = vector.broadcast %7 : vector<1x128xf32> to vector<2x128xf32>
    %9 = arith.select %5, %8, %2 : vector<2x128xi1>, vector<2x128xf32>
    %c0_i32 = arith.constant 0 : i32
    %10 = vector.broadcast %c0_i32 : i32 to vector<2x128xi32>
    %11 = arith.cmpi eq, %3, %10 : vector<2x128xi32>
    %12 = vector.extract_strided_slice %2 {offsets = [1, 0], sizes = [1, 128], strides = [1, 1]} : vector<2x128xf32> to vector<1x128xf32>
    %13 = vector.shape_cast %12 : vector<1x128xf32> to vector<1x128xf32>
    %14 = vector.broadcast %13 : vector<1x128xf32> to vector<2x128xf32>
    %15 = arith.select %11, %14, %9 : vector<2x128xi1>, vector<2x128xf32>
    %16 = vector.broadcast %0 : vector<2x1xf32> to vector<2x128xf32>
    %17 = arith.mulf %16, %1 : vector<2x128xf32>
    %cst = arith.constant 1.000000e+00 : f32
    %18 = vector.broadcast %cst : f32 to vector<2x1xf32>
    %19 = arith.subf %18, %0 : vector<2x1xf32>
    %20 = vector.broadcast %19 : vector<2x1xf32> to vector<2x128xf32>
    %21 = arith.mulf %20, %15 : vector<2x128xf32>
    %22 = arith.addf %17, %21 : vector<2x128xf32>
    %c0_5 = arith.constant 0 : index
    %c0_6 = arith.constant 0 : index
    %23 = vector.load %arg5[%c0_5, %c0_6] : memref<2x128xf32, #tpu.memory_space<vmem>>, vector<2x128xf32>
    tpu.vector_store %arg5[%c0_5, %c0_6], %22 {strides = array<i32>} : memref<2x128xf32, #tpu.memory_space<vmem>>, vector<2x128xf32>,
    return
  }
  func.func @transform_0(%arg0: i32, %arg1: i32) -> (i32, i32) {
    %c0_i32 = arith.constant 0 : i32
    %c0_i32_0 = arith.constant 0 : i32
    return %arg0, %c0_i32 : i32, i32
  }
  func.func @transform_1(%arg0: i32, %arg1: i32) -> (i32, i32) {
    %c0_i32 = arith.constant 0 : i32
    return %arg0, %arg1 : i32, i32
  }
  func.func @transform_2(%arg0: i32, %arg1: i32) -> (i32, i32) {
    %c0_i32 = arith.constant 0 : i32
    %0 = arith.subi %c0_i32, %arg0 : i32
    %c0_i32_0 = arith.constant 0 : i32
    return %0, %arg1 : i32, i32
  }
  func.func @transform_3(%arg0: i32, %arg1: i32) -> (i32, i32) {
    %c0_i32 = arith.constant 0 : i32
    return %arg0, %arg1 : i32, i32
  }
}

</mosaic_0001>

<bundles_post_ra>
// kernel: _swmixup_apply.3
= control target key start
LH: loop header
LB: loop body
LE: loop exit
PB: predicated region body
PF: predicated region fallthrough
CT: control target
= control target key end

     0   :  { %v109_v1 = vmov 0   ;;  %s143_s0 = inlined_call_operand.vmem [shape: f32[2,1], index: 0, kind: input, shape index: {}]   ;;  %s144_s1 = inlined_call_operand.vmem [shape: f32[2,128], index: 1, kind: input, shape index: {}, may-alias: {1,2}]   ;;  %s145_s2 = inlined_call_operand.vmem [shape: f32[2,128], index: 2, kind: input, shape index: {}, may-alias: {1,2}]   ;;  %s146_s3 = inlined_call_operand.hbm [shape: f32[2,128], index: 3, kind: output, shape index: {}]  }
   0x1   :  { %v32_v0 = vld [vmem:[%s143_s0] sm:$0x3]  ;;  %86 = vset.pattern.permute.xlu0 %v109_v1 }
   0x2   :  { %8 = vsyncpa [#allocation3], 0  ;;  %51 = vperm.xlu0 %86, %v32_v0   ;;  %v55_v2 = vsub.f32 1.0, %v32_v0  ;;  %v35_v3 = vlaneseq  ;;  %v34_v6 = vld [vmem:[%s145_s2] sm:$0x3]  ;;  %s110_s17 = smov [#allocation2]  }
   0x3   :  { %v33_v12 = vld [vmem:[%s144_s1] sm:$0x3]  ;;  %s70_s18 = sshll.u32 %s110_s17, 4  ;;  %s71_s18 = int_to_ptr.vmem [resolvable:$true] %s70_s18 }
   0x4   :  { %v36_v4 = vshrl.u32 %v35_v3, 7  ;;  %s87_s2 = scalar_lea.vmem %s71_s18, 32  ;;  %p92_p1 = scmp.lt.s32.totalorder %s71_s18, %s71_s18 }
   0x5   :  { %p88_p0 = scmp.ne.s32.totalorder %s71_s18, %s87_s2  ;;  %p93_p2 = scmp.lt.s32.totalorder %s87_s2, %s87_s2 }
   0x6   :  { %58 = vperm.xlu0 %86, %v55_v2   ;;  %v40_v5 = vsub.s32 0, %v36_v4  ;;  %v46_v7 = vsub.s32 1, %v36_v4  ;;  %vm37_vm0 = vcmp.eq.s32.totalorder %v36_v4, 1  ;;  %vm43_vm1 = vcmp.eq.s32.totalorder %v36_v4, 0 }
   0x7   :  { %p94_p3 = por %p93_p2, %p92_p1 }
   0x8   :  { %v41_v8 = vrot.slane %v34_v6, %v40_v5  ;;  %v47_v9 = vrot.slane %v34_v6, %v46_v7 }
   0x9   :  { %p95_p4 = pnand %p94_p3, %p88_p0 }
   0xa   :  { %v42_v10 = vsel %vm37_vm0, %v41_v8, %v34_v6 }
   0xb   :  { %v48_v13 = vsel %vm43_vm1, %v47_v9, %v42_v10 }
  0x7d   :  { %v52_v11 = vpop.permute.xlu0 %51 }
  0x7e   :  { %v54_v15 = vmul.f32 %v52_v11, %v33_v12 }
  0x81   :  { %v59_v14 = vpop.permute.xlu0 %58 }
  0x82   :  { %v61_v16 = vmul.f32 %v59_v14, %v48_v13 }
  0x84   :  { %v62_v17 = vadd.f32 %v61_v16, %v54_v15 }
  0x86   :  { %63 = vst [vmem:[#allocation2] sm:$0x3] %v62_v17 }
  0x87   :  { %98 = shalt.err (!%p95_p4)
}
  0x88   :  { %73 = dma.vmem_to_hbm [thread:$0]  %s71_s18, 32, %s146_s3, [#allocation3]  }
  0x89   :  { %107 = dma.done.wait [#allocation3], 32  }
  0x8a   :  { %108 = vsyncadd [#allocation3], 4294967264 }
  0x8b   :  { %77 = vsyncpa [#allocation3], 1 }

// kernel: _swmixup_apply.2
= control target key start
LH: loop header
LB: loop body
LE: loop exit
PB: predicated region body
PF: predicated region fallthrough
CT: control target
= control target key end

     0   :  { %v389_v0 = vmov 0   ;;  %v39_v3 = vlaneseq  ;;  %v390_v4 = vmov 1983009808   ;;  %s516_s0 = inlined_call_operand.vmem [shape: f32[2,1], index: 0, kind: input, shape index: {}]   ;;  %s517_s1 = inlined_call_operand.vmem [shape: f32[2,1024], index: 1, kind: input, shape index: {}, may-alias: {1,2}]   ;;  %s518_s2 = inlined_call_operand.vmem [shape: f32[2,1024], index: 2, kind: input, shape index: {}, may-alias: {1,2}]   ;;  %s519_s3 = inlined_call_operand.vmem [shape: f32[2,1024], index: 3, kind: output, shape index: {}]  }
   0x1   :  { %384 = vset.pattern.permute.xlu0 %v389_v0  ;;  %v34_v1 = vld [vmem:[%s516_s0] sm:$0x3]  ;;  %v118_v5 = vunpack.c.l.s4 %v390_v4  ;;  %v428_v10 = vld [vmem:[%s518_s2 + $0x8] sm:$0xff] }
   0x2   :  { %249 = vperm.xlu0 %384, %v34_v1   ;;  %v304_v2 = vsub.f32 1.0, %v34_v1  ;;  %v414_v6 = vshrl.u32 %v39_v3, 7  ;;  %v35_v8 = vld [vmem:[%s517_s1] sm:$0xff]  ;;  %v36_v13 = vld [vmem:[%s517_s1 + $0x8] sm:$0xff]  ;;  %v133_v18 = vcombine.high %v428_v10, %v428_v10 }
   0x3   :  { %v37_v9 = vld [vmem:[%s518_s2] sm:$0xff]  ;;  %v119_v12 = vunpack.c.0.s8 %v118_v5  ;;  %v254_v19 = vcombine.high %v35_v8, %v35_v8  ;;  %v271_v22 = vcombine.high %v36_v13, %v36_v13 }
   0x4   :  { %v417_v7 = vsub.s32 0, %v414_v6  ;;  %v54_v11 = vsub.s32 4, %v414_v6  ;;  %v50_v14 = vsub.s32 2, %v414_v6  ;;  %v58_v15 = vsub.s32 6, %v414_v6 }
   0x5   :  { %v116_v17 = vcombine.high %v37_v9, %v37_v9  ;;  %vm41_vm0 = vcmp.eq.s32.totalorder %v414_v6, 1  ;;  %v441_v21 = vsub.s32 %v119_v12, %v414_v6  ;;  %v169_v30 = vsub.s32 1, %v414_v6 }
   0x6   :  { %307 = vperm.xlu0 %384, %v304_v2   ;;  %v47_v16 = vrot.slane %v37_v9, %v417_v7  ;;  %v55_v20 = vrot.slane %v37_v9, %v54_v11  ;;  %v51_v23 = vrot.slane %v37_v9, %v50_v14  ;;  %v59_v24 = vrot.slane %v37_v9, %v58_v15 }
   0x7   :  { %v63_v25 = vrot.slane %v428_v10, %v417_v7  ;;  %v67_v26 = vrot.slane %v428_v10, %v50_v14  ;;  %v71_v27 = vrot.slane %v428_v10, %v54_v11  ;;  %v75_v28 = vrot.slane %v428_v10, %v58_v15 }
   0x8   :  { %v123_v29 = vrot.slane %v37_v9, %v441_v21  ;;  %v87_v31 = vrot.slane %v47_v16, %v417_v7  ;;  %v130_v32 = vrot.slane %v116_v17, %v441_v21  ;;  %v140_v33 = vrot.slane %v428_v10, %v441_v21 }
   0x9   :  { %v147_v34 = vrot.slane %v133_v18, %v441_v21  ;;  %v95_v35 = vrot.slane %v55_v20, %v417_v7  ;;  %v173_v36 = vsub.s32 3, %v414_v6  ;;  %v177_v37 = vsub.s32 5, %v414_v6 }
   0xa   :  { %v181_v38 = vsub.s32 7, %v414_v6  ;;  %v91_v39 = vrot.slane %v51_v23, %v417_v7  ;;  %v99_v40 = vrot.slane %v59_v24, %v417_v7  ;;  %v103_v41 = vrot.slane %v63_v25, %v417_v7 }
   0xb   :  { %v107_v42 = vrot.slane %v67_v26, %v417_v7  ;;  %vm166_vm1 = vcmp.eq.s32.totalorder %v414_v6, 0  ;;  %v111_v43 = vrot.slane %v71_v27, %v417_v7  ;;  %v115_v44 = vrot.slane %v75_v28, %v417_v7 }
   0xc   :  { %v131_v45 = vcombine.high %v123_v29, %v123_v29  ;;  %v170_v46 = vrot.slane %v37_v9, %v169_v30  ;;  %v132_v47 = vcombine.high %v130_v32, %v130_v32  ;;  %v148_v48 = vcombine.high %v140_v33, %v140_v33 }
   0xd   :  { %v149_v49 = vcombine.high %v147_v34, %v147_v34  ;;  %v158_v50 = vsel %vm41_vm0, %v87_v31, %v123_v29  ;;  %v160_v51 = vsel %vm41_vm0, %v95_v35, %v130_v32  ;;  %v174_v52 = vrot.slane %v37_v9, %v173_v36 }
   0xe   :  { %v178_v53 = vrot.slane %v37_v9, %v177_v37  ;;  %v182_v54 = vrot.slane %v37_v9, %v181_v38  ;;  %v186_v55 = vrot.slane %v428_v10, %v169_v30  ;;  %v190_v56 = vrot.slane %v428_v10, %v173_v36 }
   0xf   :  { %v194_v57 = vrot.slane %v428_v10, %v177_v37  ;;  %v198_v58 = vrot.slane %v428_v10, %v181_v38  ;;  %v162_v59 = vsel %vm41_vm0, %v103_v41, %v140_v33  ;;  %v164_v60 = vsel %vm41_vm0, %v111_v43, %v147_v34 }
  0x10   :  { %v261_v61 = vrot.slane %v35_v8, %v441_v21  ;;  %v268_v62 = vrot.slane %v254_v19, %v441_v21  ;;  %v159_v63 = vsel %vm41_vm0, %v91_v39, %v131_v45  ;;  %v161_v0 = vsel %vm41_vm0, %v99_v40, %v132_v47 }
  0x11   :  { %v278_v1 = vrot.slane %v36_v13, %v441_v21  ;;  %v285_v2 = vrot.slane %v271_v22, %v441_v21  ;;  %v210_v3 = vrot.slane %v170_v46, %v169_v30  ;;  %v214_v4 = vrot.slane %v174_v52, %v169_v30 }
  0x12   :  { %v218_v5 = vrot.slane %v178_v53, %v169_v30  ;;  %v222_v7 = vrot.slane %v182_v54, %v169_v30  ;;  %v226_v9 = vrot.slane %v186_v55, %v169_v30  ;;  %v230_v10 = vrot.slane %v190_v56, %v169_v30 }
  0x13   :  { %v234_v11 = vrot.slane %v194_v57, %v169_v30  ;;  %v238_v8 = vrot.slane %v198_v58, %v169_v30  ;;  %v163_v12 = vsel %vm41_vm0, %v107_v42, %v148_v48  ;;  %v165_v14 = vsel %vm41_vm0, %v115_v44, %v149_v49 }
  0x14   :  { %v269_v15 = vcombine.high %v261_v61, %v261_v61  ;;  %v270_v16 = vcombine.high %v268_v62, %v268_v62  ;;  %v286_v13 = vcombine.high %v278_v1, %v278_v1  ;;  %v287_v18 = vcombine.high %v285_v2, %v285_v2 }
  0x15   :  { %v239_v19 = vsel %vm166_vm1, %v210_v3, %v158_v50  ;;  %v240_v20 = vsel %vm166_vm1, %v214_v4, %v159_v63  ;;  %v241_v22 = vsel %vm166_vm1, %v218_v5, %v160_v51  ;;  %v242_v23 = vsel %vm166_vm1, %v222_v7, %v161_v0 }
  0x16   :  { %v243_v24 = vsel %vm166_vm1, %v226_v9, %v162_v59  ;;  %v244_v25 = vsel %vm166_vm1, %v230_v10, %v163_v12  ;;  %v245_v26 = vsel %vm166_vm1, %v234_v11, %v164_v60  ;;  %v246_v27 = vsel %vm166_vm1, %v238_v8, %v165_v14 }
  0x7d   :  { %v250_v17 = vpop.permute.xlu0 %249 }
  0x7e   :  { %v296_v28 = vmul.f32 %v261_v61, %v250_v17  ;;  %v297_v29 = vmul.f32 %v269_v15, %v250_v17  ;;  %v298_v30 = vmul.f32 %v268_v62, %v250_v17  ;;  %v299_v31 = vmul.f32 %v270_v16, %v250_v17 }
  0x7f   :  { %v300_v32 = vmul.f32 %v278_v1, %v250_v17  ;;  %v301_v33 = vmul.f32 %v286_v13, %v250_v17  ;;  %v302_v34 = vmul.f32 %v285_v2, %v250_v17  ;;  %v303_v35 = vmul.f32 %v287_v18, %v250_v17 }
  0x81   :  { %v308_v36 = vpop.permute.xlu0 %307 }
  0x82   :  { %v310_v37 = vmul.f32 %v308_v36, %v239_v19  ;;  %v311_v38 = vmul.f32 %v308_v36, %v240_v20  ;;  %v312_v39 = vmul.f32 %v308_v36, %v241_v22  ;;  %v313_v40 = vmul.f32 %v308_v36, %v242_v23 }
  0x83   :  { %v314_v41 = vmul.f32 %v308_v36, %v243_v24  ;;  %v315_v42 = vmul.f32 %v308_v36, %v244_v25  ;;  %v316_v43 = vmul.f32 %v308_v36, %v245_v26  ;;  %v317_v44 = vmul.f32 %v308_v36, %v246_v27 }
  0x84   :  { %v318_v45 = vadd.f32 %v310_v37, %v296_v28  ;;  %v319_v6 = vadd.f32 %v311_v38, %v297_v29  ;;  %v320_v46 = vadd.f32 %v312_v39, %v298_v30  ;;  %v321_v47 = vadd.f32 %v313_v40, %v299_v31 }
  0x85   :  { %v322_v48 = vadd.f32 %v314_v41, %v300_v32  ;;  %v323_v49 = vadd.f32 %v315_v42, %v301_v33  ;;  %v324_v50 = vadd.f32 %v316_v43, %v302_v34  ;;  %v325_v51 = vadd.f32 %v317_v44, %v303_v35 }
  0x86   :  { %v334_v52 = vcombine.low %v318_v45, %v319_v6  ;;  %v335_v53 = vcombine.low %v320_v46, %v321_v47 }
  0x87   :  { %v351_v54 = vcombine.low %v322_v48, %v323_v49  ;;  %v352_v55 = vcombine.low %v324_v50, %v325_v51 }
  0x88   :  { %v342_v56 = vrot.slane %v334_v52, %v441_v21  ;;  %v349_v57 = vrot.slane %v335_v53, %v441_v21 }
  0x89   :  { %v359_v58 = vrot.slane %v351_v54, %v441_v21  ;;  %v366_v59 = vrot.slane %v352_v55, %v441_v21 }
  0x8a   :  { %v350_v60 = vcombine.low %v342_v56, %v349_v57 }
  0x8b   :  { %v367_v61 = vcombine.low %v359_v58, %v366_v59 }
  0x8c   :  { %370 = vst [vmem:[%s519_s3] sm:$0xff] %v350_v60 }
  0x8d   :  { %371 = vst [vmem:[%s519_s3 + $0x8] sm:$0xff] %v367_v61 }

</bundles_post_ra>
